<compile_context>
chip_gen: v7x
topology: tpu7x:2x2x1
jax: 0.10.0
libtpu: 0.0.40
codegen_flags: <defaults>
</compile_context>

<pallas_src>
import jax
import jax.numpy as jnp
from jax.experimental import pallas as pl
from jax.experimental.pallas import tpu as pltpu


# ---------------------------------------------------------------------------
# Kernels
# ---------------------------------------------------------------------------
def _tile_loss(feat_f32, scent_f32, inv_col, out_ref):
    """Shared loss core for one batch tile: sum_i ||feat_i - scent_i||^2 * inv_i."""
    diff = feat_f32 - scent_f32                             # (TB, D) f32 (VPU)
    sq = jnp.sum(diff * diff, axis=1, keepdims=True)        # (TB, 1)  lane reduce (XLU)
    # Per-tile partial sum; final tiny reduction happens in the wrapper.
    out_ref[...] = jnp.sum(sq * inv_col).reshape(1, 1, 1)


def center_loss_resident_kernel(feat_ref,      # (TB, D) feat tile (VMEM)
                                centers_ref,   # (C, D) centers, VMEM-resident (fetched once)
                                lab_ref,       # (TB, 1) int32 labels of this tile
                                inv_ref,       # (TB, 1) f32 = 1 / counts[label] for this tile
                                out_ref):      # (1, 1, 1) f32 per-tile partial sum
    tb = feat_ref.shape[0]
    c = centers_ref.shape[0]
    feat = feat_ref[...].astype(jnp.float32)
    centers = centers_ref[...].astype(jnp.float32)
    # In-VMEM gather of centers[label] as a one-hot MXU matmul (C is small enough
    # that centers are resident; no per-row DMA descriptors).
    onehot = (lab_ref[...] == jax.lax.broadcasted_iota(jnp.int32, (tb, c), 1)
              ).astype(jnp.float32)                          # (TB, C)
    scent = jnp.dot(onehot, centers, preferred_element_type=jnp.float32)  # (TB, D)
    _tile_loss(feat, scent, inv_ref[...], out_ref)


def center_loss_pregathered_kernel(feat_ref,    # (TB, D) feat tile
                                   scent_ref,   # (TB, D) centers[label] tile (pre-gathered)
                                   inv_ref,     # (TB, 1)
                                   out_ref):    # (1, 1, 1)
    """Large-C*D path: scent = centers[label] was gathered by XLA in the wrapper."""
    _tile_loss(feat_ref[...].astype(jnp.float32),
               scent_ref[...].astype(jnp.float32),
               inv_ref[...], out_ref)


# ---------------------------------------------------------------------------
# Wrapper
# ---------------------------------------------------------------------------
def _vmem_capacity_bytes():
    try:
        return int(pltpu.get_tpu_info().vmem_capacity_bytes)
    except Exception:
        return 64 << 20   # conservative default: v7x per-TensorCore VMEM


def _pick_batch_tile(B, D, feat_itemsize, fixed_bytes, cap):
    """Largest batch tile that divides B and fits the per-tile VMEM budget."""
    budget = max(cap // 2 - fixed_bytes, 1 << 20)
    per_row = D * (2 * feat_itemsize + 6 * 4)   # double-buffered feat + f32 temporaries
    for tb in (1024, 512, 256, 128, 64, 32, 16, 8):
        if B % tb == 0 and tb * per_row <= budget:
            return tb
    return 8 if B % 8 == 0 else B


def center_loss(feat, centers, label):
    """feat: (B, D), centers: (C, D), label: (B,) int -> scalar f32 loss."""
    B, D = feat.shape
    C = centers.shape[0]
    lab = label.astype(jnp.int32)

    # inv_counts = 1 / histc(label, bins=C, min=0, max=C)[label], computed exactly
    # once in the wrapper (O(B), free in XLA) — no in-kernel O(TB*B) label compares.
    counts = jnp.zeros((C,), jnp.float32).at[lab].add(1.0)
    inv_counts = (1.0 / counts[lab]).reshape(B, 1)           # always finite: counts >= 1

    cap = _vmem_capacity_bytes()
    centers_bytes = C * D * (centers.dtype.itemsize + 4)     # resident copy + f32 upcast
    resident = centers_bytes <= cap // 4                     # generation-aware threshold

    fixed = centers_bytes if resident else 0
    TB = _pick_batch_tile(B, D, feat.dtype.itemsize, fixed, cap)
    num_tiles = B // TB

    tile_bytes = TB * D * (2 * feat.dtype.itemsize + 6 * 4)
    vmem_limit = int(min(cap * 3 // 4, max(32 << 20, fixed + 4 * tile_bytes)))

    compiler_params = pltpu.CompilerParams(
        dimension_semantics=("parallel",),   # tiles independent (megacore shard on v7x)
        vmem_limit_bytes=vmem_limit,
    )

    out_shape = jax.ShapeDtypeStruct((num_tiles, 1, 1), jnp.float32)
    out_spec = pl.BlockSpec((1, 1, 1), lambda t: (t, 0, 0))
    feat_spec = pl.BlockSpec((TB, D), lambda t: (t, 0))
    col_spec = pl.BlockSpec((TB, 1), lambda t: (t, 0))

    # TODO(synk): for D < 128 the vregs are lane-under-utilized; packing 128/D
    # logical rows per vreg row would restore full lane occupancy.

    if resident:
        partials = pl.pallas_call(
            center_loss_resident_kernel,
            out_shape=out_shape,
            grid=(num_tiles,),
            in_specs=[
                feat_spec,                                    # feat tile
                pl.BlockSpec((C, D), lambda t: (0, 0)),       # centers: fetched once, VMEM-resident
                col_spec,                                     # labels of this tile
                col_spec,                                     # 1 / counts[label] for this tile
            ],
            out_specs=out_spec,
            compiler_params=compiler_params,
        )(feat, centers, lab.reshape(B, 1), inv_counts)
    else:
        # Very large C*D: one bulk XLA gather instead of TB tiny per-row DMAs/tile.
        # TODO(synk): a manually double-buffered in-kernel DMA gather (pipelined
        # across grid steps) would avoid materializing scent in HBM for huge C*D.
        scent = centers[lab]
        partials = pl.pallas_call(
            center_loss_pregathered_kernel,
            out_shape=out_shape,
            grid=(num_tiles,),
            in_specs=[feat_spec, feat_spec, col_spec],
            out_specs=out_spec,
            compiler_params=compiler_params,
        )(feat, scent, inv_counts)

    # Tiny final reduce over num_tiles partial sums.
    return jnp.sum(partials) / jnp.float32(B)


# ---------------------------------------------------------------------------
# Pure-JAX reference mirroring the PyTorch forward.
# ---------------------------------------------------------------------------
def center_loss_ref(feat, centers, label):
    C = centers.shape[0]
    scent = centers[label]                                           # (B, D)
    counts = jnp.sum(jax.nn.one_hot(label, C, dtype=jnp.float32), axis=0)
    scounts = counts[label]                                          # (B,)
    return jnp.sum(
        jnp.sum((feat.astype(jnp.float32) - scent.astype(jnp.float32)) ** 2, axis=1)
        / scounts) / label.shape[0]


if __name__ == "__main__":
    # Module init shapes: centers ~ randn(classes_dim, feature_dim)
    classes_dim = 10
    feature_dim = 32
    batch = 8

    key = jax.random.PRNGKey(0)
    k_feat, k_cent, k_lab = jax.random.split(key, 3)

    feat = jax.random.normal(k_feat, (batch, feature_dim), dtype=jnp.float32)
    centers = jax.random.normal(k_cent, (classes_dim, feature_dim), dtype=jnp.float32)
    label = jax.random.randint(k_lab, (batch,), 0, classes_dim, dtype=jnp.int32)

    loss = jax.block_until_ready(center_loss(feat, centers, label))
    ref = jax.block_until_ready(center_loss_ref(feat, centers, label))

    assert jnp.allclose(loss, ref, rtol=1e-5, atol=1e-5), (loss, ref)
    print("KERNEL_OK")
</pallas_src>

<mosaic_0001>
module attributes {stable_mosaic.version = 11 : i64} {
  func.func @center_loss_resident_kernel(%arg0: i32, %arg1: memref<8x32xf32, #tpu.memory_space<vmem>>, %arg2: memref<10x32xf32, #tpu.memory_space<vmem>>, %arg3: memref<8x1xi32, #tpu.memory_space<vmem>>, %arg4: memref<8x1xf32, #tpu.memory_space<vmem>>, %arg5: memref<1x1x1xf32, #tpu.memory_space<vmem>>) attributes {dimension_semantics = [#tpu.dimension_semantics<parallel>], iteration_bounds = array<i64: 1>, scalar_prefetch = 0 : i64, scratch_operands = 0 : i64, tpu.core_type = #tpu.core_type<tc>, window_params = [{transform_indices = @transform_0, window_bounds = array<i64: 8, 32>}, {pipeline_mode = #tpu.pipeline_mode<synchronous>, transform_indices = @transform_1, window_bounds = array<i64: 10, 32>}, {transform_indices = @transform_2, window_bounds = array<i64: 8, 1>}, {transform_indices = @transform_3, window_bounds = array<i64: 8, 1>}, {transform_indices = @transform_4, window_bounds = array<i64: 1, 1, 1>}]} {
    %c0 = arith.constant 0 : index
    %c0_0 = arith.constant 0 : index
    %0 = vector.load %arg1[%c0, %c0_0] : memref<8x32xf32, #tpu.memory_space<vmem>>, vector<8x32xf32>
    %c0_1 = arith.constant 0 : index
    %c0_2 = arith.constant 0 : index
    %1 = vector.load %arg2[%c0_1, %c0_2] : memref<10x32xf32, #tpu.memory_space<vmem>>, vector<10x32xf32>
    %c0_3 = arith.constant 0 : index
    %c0_4 = arith.constant 0 : index
    %2 = vector.load %arg3[%c0_3, %c0_4] : memref<8x1xi32, #tpu.memory_space<vmem>>, vector<8x1xi32>
    %3 = tpu.iota {dimensions = array<i32: 1>} : vector<8x10xi32>
    %4 = vector.broadcast %2 : vector<8x1xi32> to vector<8x10xi32>
    %5 = arith.cmpi eq, %4, %3 : vector<8x10xi32>
    %6 = arith.extui %5 : vector<8x10xi1> to vector<8x10xi32>
    %7 = arith.sitofp %6 : vector<8x10xi32> to vector<8x10xf32>
    %cst = arith.constant dense<0.000000e+00> : vector<8x32xf32>
    %8 = tpu.matmul %7, %1, %cst {dimension_numbers = #tpu.dot_dimension_numbers<[1], [0], [0], [1], [0, 0, 1, 1], [], []>} : vector<8x10xf32>, vector<10x32xf32>, vector<8x32xf32> -> vector<8x32xf32>
    %c0_5 = arith.constant 0 : index
    %c0_6 = arith.constant 0 : index
    %9 = vector.load %arg4[%c0_5, %c0_6] : memref<8x1xf32, #tpu.memory_space<vmem>>, vector<8x1xf32>
    %10 = arith.subf %0, %8 : vector<8x32xf32>
    %11 = arith.mulf %10, %10 : vector<8x32xf32>
    %cst_7 = arith.constant dense<0.000000e+00> : vector<8xf32>
    %12 = vector.multi_reduction <add>, %11, %cst_7 [1] : vector<8x32xf32> to vector<8xf32>
    %13 = vector.shape_cast %12 : vector<8xf32> to vector<8x1xf32>
    %14 = arith.mulf %13, %9 : vector<8x1xf32>
    %15 = vector.shape_cast %14 : vector<8x1xf32> to vector<1x8x1xf32>
    %cst_8 = arith.constant dense<0.000000e+00> : vector<1xf32>
    %16 = vector.multi_reduction <add>, %15, %cst_8 [1, 2] : vector<1x8x1xf32> to vector<1xf32>
    %17 = vector.shape_cast %16 : vector<1xf32> to vector<1x1x1xf32>
    %18 = vector.extract %17[0, 0, 0] : f32 from vector<1x1x1xf32>
    %19 = vector.broadcast %18 : f32 to vector<1x1x1xf32>
    %c0_9 = arith.constant 0 : index
    %c0_10 = arith.constant 0 : index
    %c0_11 = arith.constant 0 : index
    %20 = vector.load %arg5[%c0_9, %c0_10, %c0_11] : memref<1x1x1xf32, #tpu.memory_space<vmem>>, vector<1x1x1xf32>
    tpu.vector_store %arg5[%c0_9, %c0_10, %c0_11], %19 {strides = array<i32>} : memref<1x1x1xf32, #tpu.memory_space<vmem>>, vector<1x1x1xf32>,
    return
  }
  func.func @transform_0(%arg0: i32) -> (i32, i32) {
    %c0_i32 = arith.constant 0 : i32
    %c0_i32_0 = arith.constant 0 : i32
    return %arg0, %c0_i32 : i32, i32
  }
  func.func @transform_1(%arg0: i32) -> (i32, i32) {
    %c0_i32 = arith.constant 0 : i32
    %c0_i32_0 = arith.constant 0 : i32
    %c0_i32_1 = arith.constant 0 : i32
    return %c0_i32, %c0_i32_0 : i32, i32
  }
  func.func @transform_2(%arg0: i32) -> (i32, i32) {
    %c0_i32 = arith.constant 0 : i32
    %c0_i32_0 = arith.constant 0 : i32
    return %arg0, %c0_i32 : i32, i32
  }
  func.func @transform_3(%arg0: i32) -> (i32, i32) {
    %c0_i32 = arith.constant 0 : i32
    %c0_i32_0 = arith.constant 0 : i32
    return %arg0, %c0_i32 : i32, i32
  }
  func.func @transform_4(%arg0: i32) -> (i32, i32, i32) {
    %c0_i32 = arith.constant 0 : i32
    %c0_i32_0 = arith.constant 0 : i32
    %c0_i32_1 = arith.constant 0 : i32
    return %arg0, %c0_i32, %c0_i32_0 : i32, i32, i32
  }
}

</mosaic_0001>

<bundles_post_ra>
// kernel: tpu_custom_call.1
= control target key start
LH: loop header
LB: loop body
LE: loop exit
PB: predicated region body
PF: predicated region fallthrough
CT: control target
= control target key end

     0   :  { %9 = vsyncpa [#allocation3], 0  ;;  %s300_s0 = inlined_call_operand.hbm [shape: f32[8,32], index: 0, kind: input, shape index: {}]   ;;  %s301_s1 = inlined_call_operand.vmem [shape: f32[10,32], index: 1, kind: input, shape index: {}]   ;;  %s302_s2 = inlined_call_operand.vmem [shape: s32[8,1], index: 2, kind: input, shape index: {}]   ;;  %s303_s3 = inlined_call_operand.vmem [shape: f32[8,1], index: 3, kind: input, shape index: {}]   ;;  %s304_s4 = inlined_call_operand.hbm [shape: f32[1,1,1], index: 4, kind: output, shape index: {}]  }
   0x1   :  { %10 = vsyncpa [#allocation4], 0  ;;  %s232_s15 = smov [#allocation2]   ;;  %s184_s19 = scalar_lea.hbm %s300_s0, 128 }
   0x2   :  { %s17_s16 = sshll.u32 %s232_s15, 4  ;;  %p185_p0 = scmp.ne.s32.totalorder %s300_s0, %s184_s19  ;;  %s18_s16 = int_to_ptr.vmem [resolvable:$true] %s17_s16 }
   0x3   :  { %p188_p1 = scmp.lt.u32.totalorder %s184_s19, %s300_s0 }
   0x5   :  { %p190_p2 = pnand %p188_p1, %p185_p0 }
   0x7   :  { %193 = shalt.err (!%p190_p2)
}
   0x8   :  { %s194_s24 = scalar_lea.vmem %s18_s16, 128  ;;  %p199_p4 = scmp.lt.s32.totalorder %s18_s16, %s18_s16 }
   0x9   :  { %p195_p3 = scmp.ne.s32.totalorder %s18_s16, %s194_s24  ;;  %p200_p5 = scmp.lt.s32.totalorder %s194_s24, %s194_s24 }
   0xb   :  { %p201_p6 = por %p200_p5, %p199_p4 }
   0xd   :  { %p202_p7 = pnand %p201_p6, %p195_p3 }
   0xf   :  { %205 = shalt.err (!%p202_p7)
}
  0x10   :  { %20 = dma.hbm_to_vmem [thread:$0]  %s300_s0, 128, %s18_s16, [#allocation3]  }
  0x11   :  { %228 = dma.done.wait [#allocation3], 128  }
  0x12   :  { %229 = vsyncadd [#allocation3], 4294967168  ;;  %v233_v0 = vmov 0   ;;  %v234_v1 = vmov 0.0|0.0   ;;  %vm46_vm0 = vcmask 1041408   ;;  %vm235_vm1 = vmmov 1  }
  0x13   :  { %183 = vset.pattern.permute.xlu0 %v233_v0  ;;  %170 = vmatprep.subr.bf16.mxu0 %v234_v1  ;;  %vm172_vm2 = vmpackc.low %vm46_vm0, %vm235_vm1  ;;  %v33_v2 = vld [vmem:[%s302_s2] sm:$0xff]  ;;  %v32_v4 = vld [vmem:[%s301_s1 + $0x8] sm:$0x3]  ;;  %vm236_vm3 = vmmov 0   ;;  %v237_v6 = vmov 0.0   ;;  %v34_v7 = vlaneseq  ;;  %vm42_vm4 = vcmask 80896  }
  0x14   :  { %v31_v3 = vld [vmem:[%s301_s1] sm:$0xff]  ;;  %37 = vperm.xlu0 %183, %v33_v2   ;;  %167 = vmatprep.mubr.msk.f32.mxu0 %vm236_vm3, %v237_v6  ;;  %vm123_vm6 = vcmask 261120   ;;  %vm128_vm7 = vcmask 7168   ;;  %s238_s2 = smov [#allocation5]   ;;  %vm140_vm8 = vcmask 0  }
  0x15   :  { %v171_v5 = vpack.c.bf16 %v32_v4, %v31_v3  ;;  %v35_v8 = vand.u32 127, %v34_v7  ;;  %v30_v11 = vld [vmem:[#allocation2] sm:$0xff]  ;;  %s148_s7 = sshll.u32 %s238_s2, 4  ;;  %s149_s7 = int_to_ptr.vmem [resolvable:$true] %s148_s7 }
  0x16   :  { %v120_v17 = vld [vmem:[%s303_s3] sm:$0xff]  ;;  %s206_s3 = scalar_lea.vmem %s149_s7, 16  ;;  %s210_s9 = scalar_lea.vmem %s149_s7, 32 }
  0x17   :  { %173 = vmatpush3.bf16.msk.msra.mxu0 %vm172_vm2, %v171_v5  ;;  %p207_p8 = scmp.ne.s32.totalorder %s149_s7, %s206_s3  ;;  %p211_p9 = scmp.lt.s32.totalorder %s149_s7, %s149_s7 }
  0x18   :  { %p212_p10 = scmp.lt.s32.totalorder %s210_s9, %s206_s3 }
  0x1a   :  { %p213_p11 = por %p212_p10, %p211_p9 }
  0x1c   :  { %p214_p12 = pnand %p213_p11, %p207_p8 }
  0x93   :  { %v38_v9 = vpop.permute.xlu0 %37 }
  0x94   :  { %vm39_vm5 = vcmp.eq.s32.totalorder %v38_v9, %v35_v8 }
  0x95   :  { %v157_v10 = vsel %vm39_vm5, 1.0, %v237_v6 }
  0x96   :  { %168 = vmatmul.mubr.msk.f32.vlgmr.msra.gmra.mrb[0].mxu0 %vm42_vm4, %v157_v10 }
 0x169   :  { %v116_v12 = vpop.f32.mrb[0].mxu0 }
 0x16a   :  { %v121_v13 = vsub.f32 %v30_v11, %v116_v12  ;;  %v169_v14 = vpop.f32.mrb[1].mxu0 }
 0x16c   :  { %v122_v15 = vmul.f32 %v121_v13, %v121_v13 }
 0x16e   :  { %v124_v16 = vsel %vm123_vm6, %v122_v15, 0.0 }
 0x16f   :  { %125 = vadd.xlane.f32.xlu0 %v124_v16 }
 0x1fc   :  { %v126_v18 = vpop.xlane.xlu0 %125 }
 0x1fd   :  { %v127_v19 = vmul.f32 %v126_v18, %v120_v17 }
 0x1ff   :  { %v129_v20 = vsel %vm128_vm7, %v127_v19, 0.0 }
 0x200   :  { %130 = vadd.xlane.f32.xlu1 %v129_v20 }
 0x28d   :  { %v131_v21 = vpop.xlane.xlu1 %130 }
 0x28e   :  { %v132_v22 = vrot.slane %v131_v21, 4 }
 0x290   :  { %v133_v23 = vadd.f32 %v132_v22, %v131_v21 }
 0x292   :  { %v134_v24 = vrot.slane %v133_v23, 2 }
 0x294   :  { %v135_v25 = vadd.f32 %v134_v24, %v133_v23 }
 0x296   :  { %v136_v26 = vrot.slane %v135_v25, 1 }
 0x298   :  { %v137_v27 = vadd.f32 %v136_v26, %v135_v25 }
 0x29a   :  { %174 = vpush %v137_v27 }
 0x2cb   :  { %s175_s8 = spop %174 }
 0x2cc   :  { %v139_v28 = vstv %s175_s8 }
 0x2cd   :  { %141 = vst.msk [vmem:[#allocation5] sm:$0x1] %vm140_vm8, %v139_v28 }
 0x2ce   :  { %217 = shalt.err (!%p214_p12)
}
 0x2cf   :  { %s218_s12 = scalar_lea.hbm %s304_s4, 16 }
 0x2d0   :  { %p219_p13 = scmp.ne.s32.totalorder %s304_s4, %s218_s12  ;;  %p222_p0 = scmp.lt.u32.totalorder %s218_s12, %s304_s4 }
 0x2d2   :  { %p224_p1 = pnand %p222_p0, %p219_p13 }
 0x2d4   :  { %227 = shalt.err (!%p224_p1)
}
 0x2d5   :  { %151 = dma.vmem_to_hbm [thread:$0]  %s149_s7, 16, %s304_s4, [#allocation4]  }
 0x2d6   :  { %230 = dma.done.wait [#allocation4], 16  }
 0x2d7   :  { %231 = vsyncadd [#allocation4], 4294967280 }
 0x2d8   :  { %155 = vsyncpa [#allocation3], 1 }
 0x2d9   :  { %156 = vsyncpa [#allocation4], 1 }

</bundles_post_ra>
